<compile_context>
chip_gen: v7x
topology: tpu7x:2x2x1
jax: 0.10.0
libtpu: 0.0.40
codegen_flags: <defaults>
</compile_context>

<pallas_src>
import jax
import jax.numpy as jnp
from jax import lax
from jax.experimental import pallas as pl
from jax.experimental.pallas import tpu as pltpu


# ---------------------------------------------------------------------------
# Tiling / budget helpers (generation-aware).
# ---------------------------------------------------------------------------
def _vmem_budget():
    """(per-step working-set budget, scoped vmem_limit_bytes), from HW VMEM."""
    cap = 64 * 1024 * 1024  # conservative default = v7x per-TensorCore VMEM
    try:
        cap = int(pltpu.get_tpu_info().vmem_capacity_bytes)
    except Exception:
        pass
    # ~3/8 of capacity as the per-step working-set target, ~3/4 as the scoped
    # ask — keeps the 4x-sized output block double-buffered with headroom:
    #   v7x (64 MiB)  -> 24 MiB tiles, 48 MiB limit
    #   v5e/v6e (128) -> 48 MiB tiles, 96 MiB limit
    return (3 * cap) // 8, (3 * cap) // 4


def _per_channel_workset_bytes(H, W, itemsize):
    """Per-channel VMEM working set for one grid step."""
    return itemsize * (
        2 * H * W                     # input block, double-buffered
        + 2 * 4 * H * W               # output block (4 slabs), double-buffered
        + (H + 12) * (W + 12)         # padded input
        + (H + 8) * (W + 12)          # H-pooled (extended)
        + (H + 8) * (W + 8)           # 5x5 pool (extended)
        + 2 * (H + 8) * (W + 8))      # transient temporaries


def _pick_channel_tile(C, per_c_bytes, budget_bytes, lane_aligned, prefer_split):
    """Largest channel tile (divisor of C) whose working set fits the budget.

    lane_aligned restricts tiles to multiples of 128 (channels-last path).
    prefer_split keeps >= 2 grid iterations alive for megacore when possible.
    Returns None if nothing fits (caller falls back).
    """
    max_ct = budget_bytes // per_c_bytes
    if max_ct < 1:
        return None
    step = 128 if lane_aligned else 1
    fitting = [d for d in range(step, C + 1, step)
               if C % d == 0 and d <= max_ct]
    if not fitting:
        return None
    if prefer_split:
        split = [d for d in fitting if C // d >= 2]
        if split:
            return max(split)
    return max(fitting)


def _pad_value(dt):
    if jnp.issubdtype(dt, jnp.floating):
        return float("-inf")
    return int(jnp.iinfo(dt).min)


# ---------------------------------------------------------------------------
# Kernel 1: channels-last (C % 128 == 0).  C on the 128-lane axis -> lane-dense
# loads/stores; every spatial shift is a major-/sublane-axis offset (no lane
# realignment work).
# ---------------------------------------------------------------------------
def _spp_kernel_cl(x_ref, o_ref, xpad_ref, hp_ref, p5_ref):
    # x_ref:  (1, H, W, Ct)        channels-last input block
    # o_ref:  (1, 4, H, W, Ct)     slabs: [x, pool5, pool9, pool13]
    # xpad_ref: (H+12, W+12, Ct)   input extended by 6 with -inf (13x13 reach)
    # hp_ref:   (H+8,  W+12, Ct)   H-direction 5-tap max (extended domain)
    # p5_ref:   (H+8,  W+8,  Ct)   full 5x5 pool (extended domain)
    H, W, Ct = x_ref.shape[1:]
    dt = x_ref.dtype
    pad_val = _pad_value(dt)
    He, We = H + 8, W + 8

    x = x_ref[0]                          # (H, W, Ct)
    o_ref[0, 0] = x                       # slab 0: identity copy of the input

    # -inf rim only: the interior is fully overwritten every step, so a full
    # buffer fill would be a redundant (H+12)*(W+12)*Ct store pass.
    xpad_ref[0:6, :, :] = jnp.full((6, W + 12, Ct), pad_val, dt)
    xpad_ref[H + 6:H + 12, :, :] = jnp.full((6, W + 12, Ct), pad_val, dt)
    xpad_ref[6:H + 6, 0:6, :] = jnp.full((H, 6, Ct), pad_val, dt)
    xpad_ref[6:H + 6, W + 6:W + 12, :] = jnp.full((H, 6, Ct), pad_val, dt)
    xpad_ref[6:H + 6, 6:W + 6, :] = x

    # 5-tap max along H on the extended domain.
    a = xpad_ref[0:He, :, :]
    for d in (1, 2, 3, 4):
        a = jnp.maximum(a, xpad_ref[d:d + He, :, :])
    hp_ref[...] = a

    # 5-tap max along W -> extended 5x5 pool.
    b = hp_ref[:, 0:We, :]
    for d in (1, 2, 3, 4):
        b = jnp.maximum(b, hp_ref[:, d:d + We, :])
    p5_ref[...] = b

    # Slab 1: 5x5, pad 2 (center crop of the extended pool).
    o_ref[0, 1] = p5_ref[4:4 + H, 4:4 + W, :]

    # Slab 2: 9x9 via +-2-tap dilation composition of the extended 5x5 pool.
    t = jnp.maximum(p5_ref[:, 2:2 + W, :], p5_ref[:, 6:6 + W, :])
    o_ref[0, 2] = jnp.maximum(t[2:2 + H, :, :], t[6:6 + H, :, :])

    # Slab 3: 13x13 via {-4, 0, +4}-tap composition of the extended 5x5 pool.
    s3 = jnp.maximum(jnp.maximum(p5_ref[:, 0:W, :], p5_ref[:, 4:4 + W, :]),
                     p5_ref[:, 8:8 + W, :])
    o_ref[0, 3] = jnp.maximum(jnp.maximum(s3[0:H, :, :], s3[4:4 + H, :, :]),
                              s3[8:8 + H, :, :])


# ---------------------------------------------------------------------------
# Kernel 2: channel-major (small / non-128-multiple C).  Consumes NCHW blocks
# directly and emits (1, 4, Ct, H, W) blocks, so the wrapper needs no layout
# transposes at all (the final (N, 4C, H, W) view is a free reshape).
# ---------------------------------------------------------------------------
def _spp_kernel_cm(x_ref, o_ref):
    # x_ref: (1, Ct, H, W);  o_ref: (1, 4, Ct, H, W)
    Ct, H, W = x_ref.shape[1:]
    dt = x_ref.dtype
    pad_val = _pad_value(dt)
    He, We = H + 8, W + 8

    x = x_ref[0]                          # (Ct, H, W)
    o_ref[0, 0] = x                       # slab 0: identity copy of the input

    # -inf-extend along H (sublane axis), then 5-tap max.
    padh = jnp.full((Ct, 6, W), pad_val, dt)
    xh = jnp.concatenate([padh, x, padh], axis=1)       # (Ct, H+12, W)
    a = xh[:, 0:He, :]
    for d in (1, 2, 3, 4):
        a = jnp.maximum(a, xh[:, d:d + He, :])          # (Ct, H+8, W)

    # -inf-extend along W (lane axis), then 5-tap max -> extended 5x5 pool.
    padw = jnp.full((Ct, He, 6), pad_val, dt)
    aw = jnp.concatenate([padw, a, padw], axis=2)       # (Ct, H+8, W+12)
    p5 = aw[:, :, 0:We]
    for d in (1, 2, 3, 4):
        p5 = jnp.maximum(p5, aw[:, :, d:d + We])        # (Ct, H+8, W+8)

    # Slab 1: 5x5, pad 2.
    o_ref[0, 1] = p5[:, 4:4 + H, 4:4 + W]

    # Slab 2: 9x9 via +-2 taps of the extended 5x5 pool.
    t = jnp.maximum(p5[:, :, 2:2 + W], p5[:, :, 6:6 + W])
    o_ref[0, 2] = jnp.maximum(t[:, 2:2 + H, :], t[:, 6:6 + H, :])

    # Slab 3: 13x13 via {-4, 0, +4} taps of the extended 5x5 pool.
    s3 = jnp.maximum(jnp.maximum(p5[:, :, 0:W], p5[:, :, 4:4 + W]),
                     p5[:, :, 8:8 + W])
    o_ref[0, 3] = jnp.maximum(jnp.maximum(s3[:, 0:H, :], s3[:, 4:4 + H, :]),
                              s3[:, 8:8 + H, :])


# ---------------------------------------------------------------------------
# Wrapper.
# ---------------------------------------------------------------------------
def spp_reference(x):
    """Pure-JAX reference matching torch max_pool2d(k, stride=1, pad=k//2)."""
    if jnp.issubdtype(x.dtype, jnp.floating):
        init = jnp.array(-jnp.inf, x.dtype)
    else:
        init = jnp.array(jnp.iinfo(x.dtype).min, x.dtype)

    def mp(v, k, p):
        return lax.reduce_window(
            v, init, lax.max,
            window_dimensions=(1, 1, k, k), window_strides=(1, 1, 1, 1),
            padding=[(0, 0), (0, 0), (p, p), (p, p)])

    return jnp.concatenate([x, mp(x, 5, 2), mp(x, 9, 4), mp(x, 13, 6)], axis=1)


def spp(x):
    """SPP forward: x is NCHW, returns (N, 4C, H, W)."""
    N, C, H, W = x.shape
    dt = x.dtype
    itemsize = jnp.dtype(dt).itemsize
    budget, vmem_limit = _vmem_budget()
    per_c = _per_channel_workset_bytes(H, W, itemsize)

    use_cl = (C % 128 == 0)
    Ct = _pick_channel_tile(C, per_c, budget, lane_aligned=use_cl,
                            prefer_split=(N == 1))
    if Ct is None and use_cl:
        use_cl = False
        Ct = _pick_channel_tile(C, per_c, budget, lane_aligned=False,
                                prefer_split=(N == 1))
    if Ct is None:
        # TODO(synk): add an H-tiled grid axis with a 6-row halo (manual
        # make_async_copy from an ANY-space input) so huge spatial working sets
        # stay in VMEM; for now fall back to XLA's reduce_window.
        return spp_reference(x)

    grid = (N, C // Ct)
    cparams = pltpu.CompilerParams(
        dimension_semantics=("parallel", "parallel"),
        vmem_limit_bytes=vmem_limit)

    if use_cl:
        # Channels-last inside the kernel: lane-dense loads/stores for the
        # typical C >= 128 SPP regime; spatial shifts never touch the lane axis.
        x_cl = jnp.transpose(x, (0, 2, 3, 1))                  # (N, H, W, C)
        out = pl.pallas_call(
            _spp_kernel_cl,
            out_shape=jax.ShapeDtypeStruct((N, 4, H, W, C), dt),
            grid_spec=pltpu.PrefetchScalarGridSpec(
                num_scalar_prefetch=0,
                grid=grid,
                in_specs=[pl.BlockSpec((1, H, W, Ct),
                                       lambda n, c: (n, 0, 0, c))],
                out_specs=pl.BlockSpec((1, 4, H, W, Ct),
                                       lambda n, c: (n, 0, 0, 0, c)),
                scratch_shapes=[
                    pltpu.VMEM((H + 12, W + 12, Ct), dt),   # padded input
                    pltpu.VMEM((H + 8, W + 12, Ct), dt),    # H-pooled (ext.)
                    pltpu.VMEM((H + 8, W + 8, Ct), dt),     # 5x5 pool (ext.)
                ]),
            compiler_params=cparams,
        )(x_cl)
        # TODO(synk): fuse this NHWC->NCHW conversion into the kernel (in-kernel
        # transpose hidden under DMA) to recover the extra HBM pass on the
        # memory-bound generations.
        out = jnp.transpose(out, (0, 1, 4, 2, 3))              # (N, 4, C, H, W)
    else:
        # Channel-major kernel: zero wrapper transposes; C sits on a major axis
        # so a small channel count does not waste the 128-lane axis.
        out = pl.pallas_call(
            _spp_kernel_cm,
            out_shape=jax.ShapeDtypeStruct((N, 4, C, H, W), dt),
            grid_spec=pltpu.PrefetchScalarGridSpec(
                num_scalar_prefetch=0,
                grid=grid,
                in_specs=[pl.BlockSpec((1, Ct, H, W),
                                       lambda n, c: (n, c, 0, 0))],
                out_specs=pl.BlockSpec((1, 4, Ct, H, W),
                                       lambda n, c: (n, 0, c, 0, 0))),
            compiler_params=cparams,
        )(x)

    # (N, 4, C, H, W) -> (N, 4C, H, W): contiguous merge, matches torch.cat.
    return out.reshape(N, 4 * C, H, W)


if __name__ == "__main__":
    key = jax.random.PRNGKey(0)

    # Small-C regime (channel-major kernel path), module-consistent shapes.
    x_small = jax.random.normal(key, (2, 4, 16, 16), dtype=jnp.float32)
    out_small = jax.block_until_ready(spp(x_small))
    assert out_small.shape == (2, 16, 16, 16), out_small.shape
    assert jnp.allclose(out_small, spp_reference(x_small)), \
        "Pallas SPP (channel-major path) mismatch vs reference"

    # Lane-aligned regime (channels-last kernel path), still small.
    x_lane = jax.random.normal(jax.random.PRNGKey(0), (1, 128, 16, 16),
                               dtype=jnp.float32)
    out_lane = jax.block_until_ready(spp(x_lane))
    assert out_lane.shape == (1, 512, 16, 16), out_lane.shape
    assert jnp.allclose(out_lane, spp_reference(x_lane)), \
        "Pallas SPP (channels-last path) mismatch vs reference"

    print("KERNEL_OK")
</pallas_src>

<mosaic_0001>
module attributes {stable_mosaic.version = 11 : i64} {
  func.func @_spp_kernel_cm(%arg0: i32, %arg1: i32, %arg2: memref<1x4x16x16xf32, #tpu.memory_space<vmem>>, %arg3: memref<1x4x4x16x16xf32, #tpu.memory_space<vmem>>) attributes {dimension_semantics = [#tpu.dimension_semantics<parallel>, #tpu.dimension_semantics<parallel>], iteration_bounds = array<i64: 2, 1>, scalar_prefetch = 0 : i64, scratch_operands = 0 : i64, tpu.core_type = #tpu.core_type<tc>, window_params = [{transform_indices = @transform_0, window_bounds = array<i64: 1, 4, 16, 16>}, {transform_indices = @transform_1, window_bounds = array<i64: 1, 4, 4, 16, 16>}]} {
    %c0 = arith.constant 0 : index
    %c0_0 = arith.constant 0 : index
    %c0_1 = arith.constant 0 : index
    %c0_2 = arith.constant 0 : index
    %0 = vector.load %arg2[%c0, %c0_0, %c0_1, %c0_2] : memref<1x4x16x16xf32, #tpu.memory_space<vmem>>, vector<1x4x16x16xf32>
    %1 = vector.shape_cast %0 : vector<1x4x16x16xf32> to vector<4x16x16xf32>
    %c0_3 = arith.constant 0 : index
    %c0_4 = arith.constant 0 : index
    %c0_5 = arith.constant 0 : index
    %c0_6 = arith.constant 0 : index
    %c0_7 = arith.constant 0 : index
    %2 = vector.load %arg3[%c0_3, %c0_4, %c0_5, %c0_6, %c0_7] : memref<1x4x4x16x16xf32, #tpu.memory_space<vmem>>, vector<1x1x4x16x16xf32>
    %3 = vector.shape_cast %2 : vector<1x1x4x16x16xf32> to vector<4x16x16xf32>
    %4 = vector.shape_cast %1 : vector<4x16x16xf32> to vector<1x1x4x16x16xf32>
    tpu.vector_store %arg3[%c0_3, %c0_4, %c0_5, %c0_6, %c0_7], %4 {strides = array<i32>} : memref<1x4x4x16x16xf32, #tpu.memory_space<vmem>>, vector<1x1x4x16x16xf32>,
    %cst = arith.constant 0xFF800000 : f32
    %5 = vector.broadcast %cst : f32 to vector<4x6x16xf32>
    %6 = tpu.concatenate %5, %1, %5 in 1 : vector<4x6x16xf32>, vector<4x16x16xf32>, vector<4x6x16xf32> -> vector<4x28x16xf32>
    %7 = vector.extract_strided_slice %6 {offsets = [0, 0, 0], sizes = [4, 24, 16], strides = [1, 1, 1]} : vector<4x28x16xf32> to vector<4x24x16xf32>
    %8 = vector.extract_strided_slice %6 {offsets = [0, 1, 0], sizes = [4, 24, 16], strides = [1, 1, 1]} : vector<4x28x16xf32> to vector<4x24x16xf32>
    %9 = arith.maximumf %7, %8 : vector<4x24x16xf32>
    %10 = vector.extract_strided_slice %6 {offsets = [0, 2, 0], sizes = [4, 24, 16], strides = [1, 1, 1]} : vector<4x28x16xf32> to vector<4x24x16xf32>
    %11 = arith.maximumf %9, %10 : vector<4x24x16xf32>
    %12 = vector.extract_strided_slice %6 {offsets = [0, 3, 0], sizes = [4, 24, 16], strides = [1, 1, 1]} : vector<4x28x16xf32> to vector<4x24x16xf32>
    %13 = arith.maximumf %11, %12 : vector<4x24x16xf32>
    %14 = vector.extract_strided_slice %6 {offsets = [0, 4, 0], sizes = [4, 24, 16], strides = [1, 1, 1]} : vector<4x28x16xf32> to vector<4x24x16xf32>
    %15 = arith.maximumf %13, %14 : vector<4x24x16xf32>
    %cst_8 = arith.constant 0xFF800000 : f32
    %16 = vector.broadcast %cst_8 : f32 to vector<4x24x6xf32>
    %17 = tpu.concatenate %16, %15, %16 in 2 : vector<4x24x6xf32>, vector<4x24x16xf32>, vector<4x24x6xf32> -> vector<4x24x28xf32>
    %18 = vector.extract_strided_slice %17 {offsets = [0, 0, 0], sizes = [4, 24, 24], strides = [1, 1, 1]} : vector<4x24x28xf32> to vector<4x24x24xf32>
    %19 = vector.extract_strided_slice %17 {offsets = [0, 0, 1], sizes = [4, 24, 24], strides = [1, 1, 1]} : vector<4x24x28xf32> to vector<4x24x24xf32>
    %20 = arith.maximumf %18, %19 : vector<4x24x24xf32>
    %21 = vector.extract_strided_slice %17 {offsets = [0, 0, 2], sizes = [4, 24, 24], strides = [1, 1, 1]} : vector<4x24x28xf32> to vector<4x24x24xf32>
    %22 = arith.maximumf %20, %21 : vector<4x24x24xf32>
    %23 = vector.extract_strided_slice %17 {offsets = [0, 0, 3], sizes = [4, 24, 24], strides = [1, 1, 1]} : vector<4x24x28xf32> to vector<4x24x24xf32>
    %24 = arith.maximumf %22, %23 : vector<4x24x24xf32>
    %25 = vector.extract_strided_slice %17 {offsets = [0, 0, 4], sizes = [4, 24, 24], strides = [1, 1, 1]} : vector<4x24x28xf32> to vector<4x24x24xf32>
    %26 = arith.maximumf %24, %25 : vector<4x24x24xf32>
    %27 = vector.extract_strided_slice %26 {offsets = [0, 4, 4], sizes = [4, 16, 16], strides = [1, 1, 1]} : vector<4x24x24xf32> to vector<4x16x16xf32>
    %c0_9 = arith.constant 0 : index
    %c1 = arith.constant 1 : index
    %c0_10 = arith.constant 0 : index
    %c0_11 = arith.constant 0 : index
    %c0_12 = arith.constant 0 : index
    %28 = vector.load %arg3[%c0_9, %c1, %c0_10, %c0_11, %c0_12] : memref<1x4x4x16x16xf32, #tpu.memory_space<vmem>>, vector<1x1x4x16x16xf32>
    %29 = vector.shape_cast %28 : vector<1x1x4x16x16xf32> to vector<4x16x16xf32>
    %30 = vector.shape_cast %27 : vector<4x16x16xf32> to vector<1x1x4x16x16xf32>
    tpu.vector_store %arg3[%c0_9, %c1, %c0_10, %c0_11, %c0_12], %30 {strides = array<i32>} : memref<1x4x4x16x16xf32, #tpu.memory_space<vmem>>, vector<1x1x4x16x16xf32>,
    %31 = vector.extract_strided_slice %26 {offsets = [0, 0, 2], sizes = [4, 24, 16], strides = [1, 1, 1]} : vector<4x24x24xf32> to vector<4x24x16xf32>
    %32 = vector.extract_strided_slice %26 {offsets = [0, 0, 6], sizes = [4, 24, 16], strides = [1, 1, 1]} : vector<4x24x24xf32> to vector<4x24x16xf32>
    %33 = arith.maximumf %31, %32 : vector<4x24x16xf32>
    %34 = vector.extract_strided_slice %33 {offsets = [0, 2, 0], sizes = [4, 16, 16], strides = [1, 1, 1]} : vector<4x24x16xf32> to vector<4x16x16xf32>
    %35 = vector.extract_strided_slice %33 {offsets = [0, 6, 0], sizes = [4, 16, 16], strides = [1, 1, 1]} : vector<4x24x16xf32> to vector<4x16x16xf32>
    %36 = arith.maximumf %34, %35 : vector<4x16x16xf32>
    %c0_13 = arith.constant 0 : index
    %c2 = arith.constant 2 : index
    %c0_14 = arith.constant 0 : index
    %c0_15 = arith.constant 0 : index
    %c0_16 = arith.constant 0 : index
    %37 = vector.load %arg3[%c0_13, %c2, %c0_14, %c0_15, %c0_16] : memref<1x4x4x16x16xf32, #tpu.memory_space<vmem>>, vector<1x1x4x16x16xf32>
    %38 = vector.shape_cast %37 : vector<1x1x4x16x16xf32> to vector<4x16x16xf32>
    %39 = vector.shape_cast %36 : vector<4x16x16xf32> to vector<1x1x4x16x16xf32>
    tpu.vector_store %arg3[%c0_13, %c2, %c0_14, %c0_15, %c0_16], %39 {strides = array<i32>} : memref<1x4x4x16x16xf32, #tpu.memory_space<vmem>>, vector<1x1x4x16x16xf32>,
    %40 = vector.extract_strided_slice %26 {offsets = [0, 0, 0], sizes = [4, 24, 16], strides = [1, 1, 1]} : vector<4x24x24xf32> to vector<4x24x16xf32>
    %41 = vector.extract_strided_slice %26 {offsets = [0, 0, 4], sizes = [4, 24, 16], strides = [1, 1, 1]} : vector<4x24x24xf32> to vector<4x24x16xf32>
    %42 = arith.maximumf %40, %41 : vector<4x24x16xf32>
    %43 = vector.extract_strided_slice %26 {offsets = [0, 0, 8], sizes = [4, 24, 16], strides = [1, 1, 1]} : vector<4x24x24xf32> to vector<4x24x16xf32>
    %44 = arith.maximumf %42, %43 : vector<4x24x16xf32>
    %45 = vector.extract_strided_slice %44 {offsets = [0, 0, 0], sizes = [4, 16, 16], strides = [1, 1, 1]} : vector<4x24x16xf32> to vector<4x16x16xf32>
    %46 = vector.extract_strided_slice %44 {offsets = [0, 4, 0], sizes = [4, 16, 16], strides = [1, 1, 1]} : vector<4x24x16xf32> to vector<4x16x16xf32>
    %47 = arith.maximumf %45, %46 : vector<4x16x16xf32>
    %48 = vector.extract_strided_slice %44 {offsets = [0, 8, 0], sizes = [4, 16, 16], strides = [1, 1, 1]} : vector<4x24x16xf32> to vector<4x16x16xf32>
    %49 = arith.maximumf %47, %48 : vector<4x16x16xf32>
    %c0_17 = arith.constant 0 : index
    %c3 = arith.constant 3 : index
    %c0_18 = arith.constant 0 : index
    %c0_19 = arith.constant 0 : index
    %c0_20 = arith.constant 0 : index
    %50 = vector.load %arg3[%c0_17, %c3, %c0_18, %c0_19, %c0_20] : memref<1x4x4x16x16xf32, #tpu.memory_space<vmem>>, vector<1x1x4x16x16xf32>
    %51 = vector.shape_cast %50 : vector<1x1x4x16x16xf32> to vector<4x16x16xf32>
    %52 = vector.shape_cast %49 : vector<4x16x16xf32> to vector<1x1x4x16x16xf32>
    tpu.vector_store %arg3[%c0_17, %c3, %c0_18, %c0_19, %c0_20], %52 {strides = array<i32>} : memref<1x4x4x16x16xf32, #tpu.memory_space<vmem>>, vector<1x1x4x16x16xf32>,
    return
  }
  func.func @transform_0(%arg0: i32, %arg1: i32) -> (i32, i32, i32, i32) {
    %c0_i32 = arith.constant 0 : i32
    %c0_i32_0 = arith.constant 0 : i32
    %c0_i32_1 = arith.constant 0 : i32
    return %arg0, %arg1, %c0_i32, %c0_i32_0 : i32, i32, i32, i32
  }
  func.func @transform_1(%arg0: i32, %arg1: i32) -> (i32, i32, i32, i32, i32) {
    %c0_i32 = arith.constant 0 : i32
    %c0_i32_0 = arith.constant 0 : i32
    %c0_i32_1 = arith.constant 0 : i32
    %c0_i32_2 = arith.constant 0 : i32
    return %arg0, %c0_i32, %arg1, %c0_i32_0, %c0_i32_1 : i32, i32, i32, i32, i32
  }
}

</mosaic_0001>

<bundles_post_ra>
// kernel: tpu_custom_call.1
= control target key start
LH: loop header
LB: loop body
LE: loop exit
PB: predicated region body
PF: predicated region fallthrough
CT: control target
= control target key end

     0   :  { %6 = vsyncpa [#allocation3], 0  ;;  %s2094_s0 = inlined_call_operand.hbm [shape: f32[2,4,16,16], index: 0, kind: input, shape index: {}]   ;;  %s2095_s1 = inlined_call_operand.hbm [shape: f32[2,4,4,16,16], index: 1, kind: output, shape index: {}]  }
   0x1   :  { %8 = vsyncpa [#allocation3 + $0x1], 0 }
   0x2   :  { %9 = vsyncpa [#allocation4], 0 }
   0x3   :  { %11 = vsyncpa [#allocation4 + $0x1], 0  ;;  %s1370_s6 = smov 0   ;;  %s1372_s7 = smov 0  }
   0x4   :  { %s1374_s8 = smov 0   ;;  %s1376_s9 = smov 0  }
   0x5   :  { %s1378_s10 = smov 0   ;;  %s1380_s11 = smov 0  }
   0x6 LB: > { %s1111_s12 = sadd.s32 4294967295, %s1345_s11   ;;  %s1112_s13 = sadd.s32 4294967294, %s1345_s11   ;;  %s1345_s11 = sphi %s1380_s11, %s17_s11   ;;  %s1341_s10 = sphi %s1378_s10, %s2110_s10   ;;  %s1337_s9 = sphi %s1376_s9, %s2109_s9   ;;  %s1333_s8 = sphi %s1374_s8, %s2108_s8   ;;  %s1329_s7 = sphi %s1372_s7, %s2107_s7   ;;  %s1325_s6 = sphi %s1370_s6, %s2106_s6  }
   0x7   : > { %s29_s14 = sadd.s32 1, %s1341_s10  ;;  %s38_s15 = sadd.s32 1, %s1333_s8 }
   0x8   : > { %p31_p0 = scmp.ge.s32.totalorder %s29_s14, 2  ;;  %p45_p1 = scmp.ne.s32.totalorder %s1333_s8, %s1329_s7 }
   0x9   : > { %p46_p2 = scmp.eq.s32.totalorder %s1345_s11, 0  ;;  %p51_p3 = scmp.ne.s32.totalorder %s1329_s7, %s1325_s6 }
   0xa   : > { %s2112_s14 = smov (%p31_p0, %s29_s14), 0  ;;  %p52_p5 = scmp.eq.s32.totalorder %s1111_s12, 0 }
   0xb   : > { %p1411_p4 = por %p46_p2, %p45_p1  ;;  %s33_s17 = ssub.s32 %s1341_s10, %s2112_s14 }
   0xc   : > { %p77_p6 = scmp.eq.s32.totalorder %s1111_s12, 1  ;;  %p36_p7 = scmp.eq.s32.totalorder %s33_s17, 0 }
   0xd   : > { %p1417_p8 = por %p52_p5, %p51_p3  ;;  %p83_p10 = scmp.eq.s32.totalorder %s1112_s13, 1 }
   0xe   : > { %p1421_p9 = por %p77_p6, %p45_p1  ;;  %p1172_p13 = scmp.lt.s32.totalorder %s1345_s11, 2 }
   0xf   : > { %s1426_s20 = scalar_select %p36_p7, %s1333_s8, %s38_s15  }
  0x10   : > { %s2099_s19 = scalar_select %p1421_p9, 1, 0 }
  0x11   : > { %p1428_p11 = por %p83_p10, %p51_p3  ;;  %s103_s22 = sand.u32 1, %s1333_s8  }
  0x12   : > { %s1115_s23 = sshll.u32 %s103_s22, 6  ;;  %s1158_s24 = sshll.u32 %s1341_s10, 10 }
  0x13   : > { %s2100_s21 = scalar_select %p1428_p11, 1, 0 }
  0x14   : > { %s1439_s27 = scalar_lea.hbm %s2094_s0, %s1158_s24  ;;  %s107_s28 = scalar_lea.vmem [#allocation2], %s1115_s23 }
  0x15   : > { %s117_s29 = sshll.u32 %s107_s28, 4  ;;  %p1445_p0 = pnand %p1172_p13, %p1411_p4  ;;  %s1441_s29 = int_to_ptr.vmem [resolvable:$true] %s117_s29 }
  0x16   : > { %s1450_s2 = scalar_lea.sflag [#allocation3], %s103_s22  ;;  %s1233_s3 = scalar_lea.hbm %s1439_s27, 1024 }
  0x17   : > { %p1234_p2 = scmp.ne.s32.totalorder %s1439_s27, %s1233_s3  ;;  %p1235_p3 = pneg %p1445_p0 }
  0x18   : > { %s1238_s12 = scalar_lea.hbm %s2094_s0, 2048  ;;  %p1239_p4 = scmp.lt.u32.totalorder %s1439_s27, %s2094_s0 }
  0x19   : > { %p1236_p5 = pnand %p1235_p3, %p1234_p2  ;;  %p1240_p7 = scmp.lt.u32.totalorder %s1238_s12, %s1233_s3 }
  0x1a   : > { %p1242_p13 = scmp.lt.u32.totalorder %s1233_s3, %s1439_s27 }
  0x1b   : > { %p1237_p6 = pneg %p1236_p5  ;;  %p1241_p10 = por %p1240_p7, %p1239_p4 }
  0x1d   : > { %p1243_p12 = por %p1242_p13, %p1241_p10 }
  0x1f   : > { %p1244_p1 = pnand %p1243_p12, %p1237_p6 }
  0x21   : > { %1247 = shalt.err (!%p1244_p1)
}
  0x22   : > { %s1248_s16 = scalar_lea.vmem %s1441_s29, 1024  ;;  %s1347_s17 = smov [#allocation2]  }
  0x23   : > { %p1249_p2 = scmp.ne.s32.totalorder %s1441_s29, %s1248_s16  ;;  %s1253_s22 = sshll.u32 %s1347_s17, 4  ;;  %s1254_s22 = int_to_ptr.vmem [resolvable:$false] %s1253_s22 }
  0x24   : > { %s1255_s23 = scalar_lea.vmem %s1254_s22, 2048  ;;  %p1256_p9 = scmp.lt.s32.totalorder %s1441_s29, %s1254_s22 }
  0x25   : > { %p1251_p5 = pnand %p1249_p2, %p1235_p3  ;;  %p1257_p4 = scmp.lt.s32.totalorder %s1255_s23, %s1248_s16 }
  0x27   : > { %p1252_p11 = pneg %p1251_p5  ;;  %p1258_p7 = por %p1257_p4, %p1256_p9 }
  0x29   : > { %p1259_p10 = pnand %p1258_p7, %p1252_p11 }
  0x2b   : > { %1262 = shalt.err (!%p1259_p10)
}
  0x2c   : > { %s1348_s24 = smov 128   ;;  %s1349_s25 = smov 8  }
  0x2d   : > { %1167 = dma.hbm_to_vmem [thread:$0]  (!%p1445_p0), %s1439_s27, 1024, %s1441_s29, %s1450_s2, %s1348_s24, %s1348_s24, %s1349_s25  }
  0x2e   : > { %p125_p12 = scmp.lt.s32.totalorder %s1345_s11, 3  ;;  %p2102_p1 = scmp.ge.s32.totalorder %s1345_s11, 1 }
  0x30   : > { %p126_p3 = pnand %p2102_p1, %p125_p12 }
  0x31   : > { %s1482_s26 = sand.u32 (!%p126_p3), 1, %s1329_s7  }
  0x32   : > { %129 = sbr.rel (%p126_p3) target bundleno = 677 (0x2a5), region = 24  ;;  %s1119_s28 = sshll.u32 (!%p126_p3), %s1482_s26, 6 }
  0x33   : > { %s132_s3 = scalar_lea.sflag (!%p126_p3), [#allocation3], %s1482_s26  ;;  %s1486_s4 = scalar_lea.vmem (!%p126_p3), [#allocation2], %s1119_s28 }
  0x39   : > { %1316 = dma.done.wait (%p1417_p8), %s132_s3, 1024  }
  0x3a   : > { %1318 = vsyncadd (%p1417_p8), %s132_s3, 4294966272  ;;  %s1120_s27 = sshll.u32 %s1482_s26, 8  ;;  %vm164_vm0 = vcmask 130048   ;;  %vm181_vm1 = vcmask 1045504   ;;  %vm223_vm2 = vcmask 1046528   ;;  %vm322_vm3 = vcmask 1044480  }
  0x3b   : > { %vm372_vm4 = vcmask 1043456   ;;  %v156_v0 = vld [vmem:[%s1486_s4] sm:$0xff]  ;;  %v157_v1 = vld [vmem:[%s1486_s4 + $0x8] sm:$0xff]  ;;  %v1350_v2 = vmov -inf   ;;  %v158_v6 = vld [vmem:[%s1486_s4 + $0x10] sm:$0xff]  ;;  %s1502_s18 = scalar_lea.vmem [#allocation5], %s1120_s27 }
  0x3c   : > { %v1495_v3 = vrot.slane %v1350_v2, 1  ;;  %v1497_v4 = vrot.slane %v1350_v2, 2  ;;  %v1499_v5 = vrot.slane %v1350_v2, 3  ;;  %166 = vst.msk [vmem:[%s1502_s18 + $0x8] sm:$0xff] %vm164_vm0, %v157_v1  ;;  %v182_v7 = vrot.slane %v156_v0, 2  ;;  %165 = vst.msk [vmem:[%s1502_s18] sm:$0xff] %vm164_vm0, %v156_v0 }
  0x3d   : > { %v183_v8 = vrot.slane %v157_v1, 2  ;;  %v1509_v9 = vld [vmem:[%s1486_s4 + $0x18] sm:$0xff]  ;;  %167 = vst.msk [vmem:[%s1502_s18 + $0x10] sm:$0xff] %vm164_vm0, %v158_v6  ;;  %v185_v10 = vrot.slane %v158_v6, 2  ;;  %v1514_v11 = vld [vmem:[%s1486_s4 + $0x20] sm:$0xff]  ;;  %v1517_v12 = vld [vmem:[%s1486_s4 + $0x28] sm:$0xff] }
  0x3e   : > { %v1519_v13 = vrot.slane %v1350_v2, 4  ;;  %168 = vst.msk [vmem:[%s1502_s18 + $0x18] sm:$0xff] %vm164_vm0, %v1509_v9  ;;  %v186_v14 = vrot.slane %v1509_v9, 2  ;;  %169 = vst.msk [vmem:[%s1502_s18 + $0x20] sm:$0xff] %vm164_vm0, %v1514_v11  ;;  %v188_v15 = vrot.slane %v1514_v11, 2  ;;  %v189_v16 = vrot.slane %v1517_v12, 2 }
  0x3f   : > { %170 = vst.msk [vmem:[%s1502_s18 + $0x28] sm:$0xff] %vm164_vm0, %v1517_v12  ;;  %v1534_v17 = vld [vmem:[%s1486_s4 + $0x30] sm:$0xff]  ;;  %v1537_v18 = vld [vmem:[%s1486_s4 + $0x38] sm:$0xff]  ;;  %v184_v19 = vsel %vm181_vm1, %v182_v7, %v183_v8  ;;  %v206_v20 = vsel %vm181_vm1, -inf, %v182_v7  ;;  %v210_v21 = vsel %vm181_vm1, %v183_v8, -inf  ;;  %v207_v22 = vsel %vm181_vm1, -inf, %v185_v10 }
  0x40   : > { %171 = vst.msk [vmem:[%s1502_s18 + $0x30] sm:$0xff] %vm164_vm0, %v1534_v17  ;;  %172 = vst.msk [vmem:[%s1502_s18 + $0x38] sm:$0xff] %vm164_vm0, %v1537_v18  ;;  %v224_v23 = vrot.slane %v206_v20, 1  ;;  %v225_v24 = vrot.slane %v184_v19, 1  ;;  %v273_v25 = vrot.slane %v206_v20, 2  ;;  %v274_v26 = vrot.slane %v184_v19, 2 }
  0x41   : > { %v323_v27 = vrot.slane %v206_v20, 3  ;;  %v324_v28 = vrot.slane %v184_v19, 3  ;;  %v373_v29 = vrot.slane %v206_v20, 4  ;;  %v374_v30 = vrot.slane %v184_v19, 4  ;;  %s1351_s29 = smov 6   ;;  %s1352_s30 = smov 127  }
  0x42   : > { %v226_v31 = vsel %vm223_vm2, %v224_v23, %v225_v24  ;;  %v275_v32 = vsel %vm181_vm1, %v273_v25, %v274_v26  ;;  %v227_v33 = vrot.slane %v210_v21, 1  ;;  %v276_v34 = vrot.slane %v210_v21, 2  ;;  %s1353_s2 = smov 126   ;;  %s1354_s5 = smov 125  }
  0x43   : > { %v261_v35 = vmax.f32 %v206_v20, %v226_v31  ;;  %v325_v36 = vsel %vm322_vm3, %v323_v27, %v324_v28  ;;  %v375_v37 = vsel %vm372_vm4, %v373_v29, %v374_v30  ;;  %v326_v38 = vrot.slane %v210_v21, 3  ;;  %s1355_s12 = smov 124   ;;  %s1356_s13 = smov 120  }
  0x44   : > { %v230_v39 = vsel %vm223_vm2, %v227_v33, %v1495_v3  ;;  %v279_v40 = vsel %vm181_vm1, %v276_v34, %v1497_v4  ;;  %v376_v41 = vrot.slane %v210_v21, 4  ;;  %v228_v42 = vsel %vm223_vm2, %v225_v24, %v227_v33  ;;  %s1159_s15 = sshll.u32 %s1337_s9, 12  ;;  %s1024_s16 = sshll.u32 %s1502_s18, 4  ;;  %s2043_s16 = int_to_ptr.vmem [resolvable:$true] %s1024_s16 }
  0x45   : > { %v310_v43 = vmax.f32 %v261_v35, %v275_v32  ;;  %v263_v44 = vmax.f32 %v210_v21, %v230_v39  ;;  %v329_v45 = vsel %vm322_vm3, %v326_v38, %v1499_v5  ;;  %v262_v46 = vmax.f32 %v184_v19, %v228_v42  ;;  %s2041_s23 = scalar_lea.hbm %s2095_s1, %s1159_s15  ;;  %s1008_s9 = scalar_lea.sflag [#allocation4], %s1482_s26 }
  0x46   : > { %v379_v47 = vsel %vm372_vm4, %v376_v41, %v1519_v13  ;;  %v277_v48 = vsel %vm181_vm1, %v274_v26, %v276_v34  ;;  %v327_v49 = vsel %vm322_vm3, %v324_v28, %v326_v38  ;;  %v377_v50 = vsel %vm372_vm4, %v374_v30, %v376_v41  ;;  %s1263_s24 = scalar_lea.vmem %s2043_s16, 4096  ;;  %p2103_p9 = scmp.ne.s32.totalorder %s2099_s19, 0 }
  0x47   : > { %v360_v51 = vmax.f32 %v310_v43, %v325_v36  ;;  %v312_v52 = vmax.f32 %v263_v44, %v279_v40  ;;  %v311_v53 = vmax.f32 %v262_v46, %v277_v48  ;;  %v187_v54 = vsel %vm181_vm1, %v185_v10, %v186_v14  ;;  %p1264_p8 = scmp.ne.s32.totalorder %s2043_s16, %s1263_s24  ;;  %s1357_s25 = smov [#allocation5]  }
  0x48   : > { %v231_v55 = vrot.slane %v207_v22, 1  ;;  %v232_v56 = vrot.slane %v187_v54, 1  ;;  %v280_v57 = vrot.slane %v207_v22, 2  ;;  %v281_v58 = vrot.slane %v187_v54, 2  ;;  %s1267_s28 = sshll.u32 %s1357_s25, 4  ;;  %s1268_s28 = int_to_ptr.vmem [resolvable:$false] %s1267_s28 }
  0x49   : > { %v410_v59 = vmax.f32 %v360_v51, %v375_v37  ;;  %v362_v60 = vmax.f32 %v312_v52, %v329_v45  ;;  %v361_v61 = vmax.f32 %v311_v53, %v327_v49  ;;  %v330_v62 = vrot.slane %v207_v22, 3  ;;  %p1265_p11 = pnand %p1264_p8, %p2103_p9  ;;  %s1269_s3 = scalar_lea.vmem %s1268_s28, 8192 }
  0x4a   : > { %v233_v63 = vsel %vm223_vm2, %v231_v55, %v232_v56  ;;  %v282_v0 = vsel %vm181_vm1, %v280_v57, %v281_v58  ;;  %v331_v1 = vrot.slane %v187_v54, 3  ;;  %v380_v2 = vrot.slane %v207_v22, 4  ;;  %p1270_p6 = scmp.lt.s32.totalorder %s2043_s16, %s1268_s28  ;;  %p1271_p13 = scmp.lt.s32.totalorder %s1269_s3, %s1263_s24 }
  0x4b   : > { %434 = vrot.lane.b32.xlu0 %v410_v59, %s1351_s29  ;;  %v412_v6 = vmax.f32 %v362_v60, %v379_v47  ;;  %v411_v7 = vmax.f32 %v361_v61, %v377_v50  ;;  %v264_v8 = vmax.f32 %v207_v22, %v233_v63  ;;  %v381_v10 = vrot.slane %v187_v54, 4  ;;  %p1266_p0 = pneg %p1265_p11 }
  0x4c   : > { %v332_v19 = vsel %vm322_vm3, %v330_v62, %v331_v1  ;;  %v211_v20 = vsel %vm181_vm1, %v186_v14, -inf  ;;  %v1580_v21 = vsel %vm181_vm1, %v188_v15, %v189_v16  ;;  %v208_v23 = vsel %vm181_vm1, -inf, %v188_v15  ;;  %p1272_p2 = por %p1271_p13, %p1270_p6 }
  0x4d   : > { %438 = vrot.lane.b32.xlu1 %v412_v6, %s1351_s29  ;;  %v313_v22 = vmax.f32 %v264_v8, %v282_v0  ;;  %v382_v24 = vsel %vm372_vm4, %v380_v2, %v381_v10  ;;  %v234_v25 = vrot.slane %v211_v20, 1  ;;  %v283_v9 = vrot.slane %v211_v20, 2 }
  0x4e   : > { %v333_v26 = vrot.slane %v211_v20, 3  ;;  %v383_v14 = vrot.slane %v211_v20, 4  ;;  %v237_v27 = vrot.slane %v208_v23, 1  ;;  %v238_v28 = vrot.slane %v1580_v21, 1  ;;  %p1273_p5 = pnand %p1272_p2, %p1266_p0 }
  0x4f   : > { %436 = vrot.lane.b32.xlu0 %v411_v7, %s1351_s29  ;;  %v363_v29 = vmax.f32 %v313_v22, %v332_v19  ;;  %v235_v30 = vsel %vm223_vm2, %v232_v56, %v234_v25  ;;  %v284_v11 = vsel %vm181_vm1, %v281_v58, %v283_v9  ;;  %v236_v15 = vsel %vm223_vm2, %v234_v25, %v1495_v3 }
  0x50   : > { %v265_v31 = vmax.f32 %v187_v54, %v235_v30  ;;  %v334_v32 = vsel %vm322_vm3, %v331_v1, %v333_v26  ;;  %v384_v33 = vsel %vm372_vm4, %v381_v10, %v383_v14  ;;  %v266_v34 = vmax.f32 %v211_v20, %v236_v15 }
  0x51   : > { %v413_v35 = vmax.f32 %v363_v29, %v382_v24  ;;  %v285_v36 = vsel %vm181_vm1, %v283_v9, %v1497_v4  ;;  %v335_v37 = vsel %vm322_vm3, %v333_v26, %v1499_v5  ;;  %v385_v38 = vsel %vm372_vm4, %v383_v14, %v1519_v13 }
  0x52   : > { %v314_v39 = vmax.f32 %v265_v31, %v284_v11  ;;  %v315_v40 = vmax.f32 %v266_v34, %v285_v36  ;;  %v239_v41 = vsel %vm223_vm2, %v237_v27, %v238_v28  ;;  %v286_v42 = vrot.slane %v208_v23, 2 }
  0x53   : > { %440 = vrot.lane.b32.xlu1 %v413_v35, %s1351_s29  ;;  %v267_v43 = vmax.f32 %v208_v23, %v239_v41  ;;  %v287_v44 = vrot.slane %v1580_v21, 2  ;;  %v336_v45 = vrot.slane %v208_v23, 3  ;;  %v337_v46 = vrot.slane %v1580_v21, 3 }
  0x54   : > { %v364_v47 = vmax.f32 %v314_v39, %v334_v32  ;;  %v365_v48 = vmax.f32 %v315_v40, %v335_v37  ;;  %v386_v49 = vrot.slane %v208_v23, 4  ;;  %v387_v50 = vrot.slane %v1580_v21, 4 }
  0x55   : > { %v288_v51 = vsel %vm181_vm1, %v286_v42, %v287_v44  ;;  %v338_v52 = vsel %vm322_vm3, %v336_v45, %v337_v46  ;;  %v212_v53 = vsel %vm181_vm1, %v189_v16, -inf  ;;  %v191_v54 = vrot.slane %v1534_v17, 2 }
  0x56   : > { %v414_v55 = vmax.f32 %v364_v47, %v384_v33  ;;  %v415_v56 = vmax.f32 %v365_v48, %v385_v38  ;;  %v316_v57 = vmax.f32 %v267_v43, %v288_v51  ;;  %v388_v58 = vsel %vm372_vm4, %v386_v49, %v387_v50 }
  0x57   : > { %v240_v59 = vrot.slane %v212_v53, 1  ;;  %v289_v60 = vrot.slane %v212_v53, 2  ;;  %v339_v61 = vrot.slane %v212_v53, 3  ;;  %v389_v62 = vrot.slane %v212_v53, 4 }
  0x58   : > { %442 = vrot.lane.b32.xlu0 %v414_v55, %s1351_s29  ;;  %444 = vrot.lane.b32.xlu1 %v415_v56, %s1351_s29  ;;  %v366_v63 = vmax.f32 %v316_v57, %v338_v52  ;;  %v192_v12 = vrot.slane %v1537_v18, 2  ;;  %v209_v16 = vsel %vm181_vm1, -inf, %v191_v54  ;;  %vm470_vm5 = vcmask 48128  }
  0x59   : > { %v241_v17 = vsel %vm223_vm2, %v238_v28, %v240_v59  ;;  %v290_v0 = vsel %vm181_vm1, %v287_v44, %v289_v60  ;;  %v340_v1 = vsel %vm322_vm3, %v337_v46, %v339_v61  ;;  %v390_v2 = vsel %vm372_vm4, %v387_v50, %v389_v62 }
  0x5a   : > { %v416_v6 = vmax.f32 %v366_v63, %v388_v58  ;;  %v268_v7 = vmax.f32 %v1580_v21, %v241_v17  ;;  %v242_v8 = vsel %vm223_vm2, %v240_v59, %v1495_v3  ;;  %v291_v10 = vsel %vm181_vm1, %v289_v60, %v1497_v4 }
  0x5b   : > { %v269_v18 = vmax.f32 %v212_v53, %v242_v8  ;;  %v341_v19 = vsel %vm322_vm3, %v339_v61, %v1499_v5  ;;  %v391_v20 = vsel %vm372_vm4, %v389_v62, %v1519_v13  ;;  %v193_v23 = vsel %vm181_vm1, %v191_v54, %v192_v12 }
  0x5c   : > { %446 = vrot.lane.b32.xlu0 %v416_v6, %s1351_s29  ;;  %v317_v22 = vmax.f32 %v268_v7, %v290_v0  ;;  %v243_v24 = vrot.slane %v209_v16, 1  ;;  %v244_v21 = vrot.slane %v193_v23, 1  ;;  %v292_v25 = vrot.slane %v209_v16, 2 }
  0x5d   : > { %v318_v9 = vmax.f32 %v269_v18, %v291_v10  ;;  %v293_v26 = vrot.slane %v193_v23, 2  ;;  %v342_v14 = vrot.slane %v209_v16, 3  ;;  %v343_v27 = vrot.slane %v193_v23, 3 }
  0x5e   : > { %v367_v28 = vmax.f32 %v317_v22, %v340_v1  ;;  %v245_v29 = vsel %vm223_vm2, %v243_v24, %v244_v21  ;;  %v392_v30 = vrot.slane %v209_v16, 4  ;;  %v393_v11 = vrot.slane %v193_v23, 4 }
  0x5f   : > { %v368_v15 = vmax.f32 %v318_v9, %v341_v19  ;;  %v270_v31 = vmax.f32 %v209_v16, %v245_v29  ;;  %v294_v32 = vsel %vm181_vm1, %v292_v25, %v293_v26  ;;  %v344_v34 = vsel %vm322_vm3, %v342_v14, %v343_v27 }
  0x60   : > { %v417_v33 = vmax.f32 %v367_v28, %v390_v2  ;;  %v213_v35 = vsel %vm181_vm1, %v192_v12, -inf  ;;  %v394_v40 = vsel %vm372_vm4, %v392_v30, %v393_v11  ;;  %vm483_vm6 = vcmask 179200  }
  0x61   : > { %v418_v36 = vmax.f32 %v368_v15, %v391_v20  ;;  %v319_v37 = vmax.f32 %v270_v31, %v294_v32  ;;  %v246_v38 = vrot.slane %v213_v35, 1  ;;  %v295_v39 = vrot.slane %v213_v35, 2 }
  0x62   : > { %448 = vrot.lane.b32.xlu1 %v417_v33, %s1351_s29  ;;  %v345_v41 = vrot.slane %v213_v35, 3  ;;  %v395_v42 = vrot.slane %v213_v35, 4  ;;  %vm749_vm7 = vcmask 130052   ;;  %vm752_vm8 = vcmask 125952  }
  0x63   : > { %450 = vrot.lane.b32.xlu0 %v418_v36, %s1351_s29  ;;  %v369_v43 = vmax.f32 %v319_v37, %v344_v34  ;;  %v247_v44 = vsel %vm223_vm2, %v244_v21, %v246_v38  ;;  %v296_v45 = vsel %vm181_vm1, %v293_v26, %v295_v39  ;;  %v248_v46 = vsel %vm223_vm2, %v246_v38, %v1495_v3 }
  0x64   : > { %v271_v47 = vmax.f32 %v193_v23, %v247_v44  ;;  %v272_v48 = vmax.f32 %v213_v35, %v248_v46  ;;  %v346_v50 = vsel %vm322_vm3, %v343_v27, %v345_v41  ;;  %v297_v51 = vsel %vm181_vm1, %v295_v39, %v1497_v4 }
  0x65   : > { %v419_v49 = vmax.f32 %v369_v43, %v394_v40  ;;  %v347_v52 = vsel %vm322_vm3, %v345_v41, %v1499_v5  ;;  %v396_v55 = vsel %vm372_vm4, %v393_v11, %v395_v42  ;;  %v397_v3 = vsel %vm372_vm4, %v395_v42, %v1519_v13 }
  0x66   : > { %v320_v53 = vmax.f32 %v271_v47, %v296_v45  ;;  %v321_v54 = vmax.f32 %v272_v48, %v297_v51  ;;  %vm883_vm9 = vcmask 123904   ;;  %vm880_vm10 = vcmask 130050  }
  0x67   : > { %452 = vrot.lane.b32.xlu1 %v419_v49, %s1351_s29 }
  0x68   : > { %v370_v56 = vmax.f32 %v320_v53, %v346_v50  ;;  %v371_v57 = vmax.f32 %v321_v54, %v347_v52 }
  0x6a   : > { %v420_v58 = vmax.f32 %v370_v56, %v396_v55  ;;  %v421_v59 = vmax.f32 %v371_v57, %v397_v3 }
  0x6c   : > { %454 = vrot.lane.b32.xlu0 %v420_v58, %s1351_s29  ;;  %456 = vrot.lane.b32.xlu1 %v421_v59, %s1351_s29 }
  0xbd   : > { %v435_v4 = vpop.permute.xlu0 %434 }
  0xbe   : > { %v471_v5 = vsel %vm470_vm5, -inf, %v435_v4 }
  0xbf   : > { %v1656_v60 = vsel %vm483_vm6, %v471_v5, -inf  ;;  %v439_v61 = vpop.permute.xlu1 %438 }
  0xc0   : > { %508 = vrot.lane.b32.xlu0 %v1656_v60, %s1352_s30  ;;  %v473_v13 = vsel %vm470_vm5, -inf, %v439_v61 }
  0xc1   : > { %v1662_v62 = vsel %vm483_vm6, %v473_v13, -inf  ;;  %v437_v63 = vpop.permute.xlu0 %436 }
  0xc2   : > { %v472_v12 = vsel %vm470_vm5, -inf, %v437_v63 }
  0xc3   : > { %v1666_v16 = vsel %vm483_vm6, %v472_v12, -inf }
  0xc4   : > { %512 = vrot.lane.b32.xlu0 %v1662_v62, %s1352_s30  ;;  %510 = vrot.lane.b32.xlu1 %v1666_v16, %s1352_s30 }
  0xc5   : > { %v441_v17 = vpop.permute.xlu1 %440 }
  0xc6   : > { %v474_v0 = vsel %vm470_vm5, -inf, %v441_v17 }
  0xc7   : > { %v1674_v1 = vsel %vm483_vm6, %v474_v0, -inf }
  0xc8   : > { %514 = vrot.lane.b32.xlu1 %v1674_v1, %s1352_s30 }
  0xca   : > { %v443_v2 = vpop.permute.xlu0 %442  ;;  %v445_v6 = vpop.permute.xlu1 %444 }
  0xcb   : > { %v475_v7 = vsel %vm470_vm5, -inf, %v443_v2  ;;  %v476_v8 = vsel %vm470_vm5, -inf, %v445_v6 }
  0xcc   : > { %v1681_v10 = vsel %vm483_vm6, %v475_v7, -inf  ;;  %v1684_v18 = vsel %vm483_vm6, %v476_v8, -inf }
  0xcd   : > { %516 = vrot.lane.b32.xlu0 %v1681_v10, %s1352_s30  ;;  %518 = vrot.lane.b32.xlu1 %v1684_v18, %s1352_s30 }
  0xce   : > { %v447_v19 = vpop.permute.xlu0 %446 }
  0xcf   : > { %v477_v20 = vsel %vm470_vm5, -inf, %v447_v19 }
  0xd0   : > { %v1692_v23 = vsel %vm483_vm6, %v477_v20, -inf }
  0xd1   : > { %520 = vrot.lane.b32.xlu0 %v1692_v23, %s1352_s30 }
  0xd4   : > { %v449_v22 = vpop.permute.xlu1 %448 }
  0xd5   : > { %v478_v24 = vsel %vm470_vm5, -inf, %v449_v22  ;;  %v451_v21 = vpop.permute.xlu0 %450 }
  0xd6   : > { %v1698_v25 = vsel %vm483_vm6, %v478_v24, -inf  ;;  %v479_v9 = vsel %vm470_vm5, -inf, %v451_v21 }
  0xd7   : > { %v1702_v26 = vsel %vm483_vm6, %v479_v9, -inf  ;;  %522 = vrot.lane.b32.xlu1 %v1698_v25, %s1352_s30 }
  0xd8   : > { %524 = vrot.lane.b32.xlu0 %v1702_v26, %s1352_s30 }
  0xd9   : > { %v453_v14 = vpop.permute.xlu1 %452 }
  0xda   : > { %v480_v27 = vsel %vm470_vm5, -inf, %v453_v14 }
  0xdb   : > { %v1710_v28 = vsel %vm483_vm6, %v480_v27, -inf }
  0xdc   : > { %526 = vrot.lane.b32.xlu1 %v1710_v28, %s1352_s30 }
  0xde   : > { %v455_v29 = vpop.permute.xlu0 %454  ;;  %v457_v30 = vpop.permute.xlu1 %456 }
  0xdf   : > { %v481_v11 = vsel %vm470_vm5, -inf, %v455_v29  ;;  %v482_v15 = vsel %vm470_vm5, -inf, %v457_v30 }
  0xe0   : > { %v1717_v31 = vsel %vm483_vm6, %v481_v11, -inf  ;;  %v1720_v32 = vsel %vm483_vm6, %v482_v15, -inf }
  0xe1   : > { %528 = vrot.lane.b32.xlu0 %v1717_v31, %s1352_s30  ;;  %530 = vrot.lane.b32.xlu1 %v1720_v32, %s1352_s30 }
  0xe5   : > { %556 = vrot.lane.b32.xlu0 %v1656_v60, %s1353_s2  ;;  %558 = vrot.lane.b32.xlu1 %v1666_v16, %s1353_s2 }
  0xe9   : > { %560 = vrot.lane.b32.xlu0 %v1662_v62, %s1353_s2  ;;  %562 = vrot.lane.b32.xlu1 %v1674_v1, %s1353_s2 }
  0xed   : > { %564 = vrot.lane.b32.xlu0 %v1681_v10, %s1353_s2  ;;  %566 = vrot.lane.b32.xlu1 %v1684_v18, %s1353_s2 }
  0xf1   : > { %568 = vrot.lane.b32.xlu0 %v1692_v23, %s1353_s2  ;;  %570 = vrot.lane.b32.xlu1 %v1698_v25, %s1353_s2 }
  0xf5   : > { %572 = vrot.lane.b32.xlu0 %v1702_v26, %s1353_s2  ;;  %574 = vrot.lane.b32.xlu1 %v1710_v28, %s1353_s2 }
  0xf9   : > { %576 = vrot.lane.b32.xlu0 %v1717_v31, %s1353_s2  ;;  %578 = vrot.lane.b32.xlu1 %v1720_v32, %s1353_s2 }
  0xfd   : > { %604 = vrot.lane.b32.xlu0 %v1656_v60, %s1354_s5  ;;  %606 = vrot.lane.b32.xlu1 %v1666_v16, %s1354_s5 }
 0x101   : > { %608 = vrot.lane.b32.xlu0 %v1662_v62, %s1354_s5  ;;  %610 = vrot.lane.b32.xlu1 %v1674_v1, %s1354_s5 }
 0x105   : > { %612 = vrot.lane.b32.xlu0 %v1681_v10, %s1354_s5  ;;  %614 = vrot.lane.b32.xlu1 %v1684_v18, %s1354_s5 }
 0x109   : > { %616 = vrot.lane.b32.xlu0 %v1692_v23, %s1354_s5  ;;  %618 = vrot.lane.b32.xlu1 %v1698_v25, %s1354_s5 }
 0x10d   : > { %620 = vrot.lane.b32.xlu0 %v1702_v26, %s1354_s5  ;;  %622 = vrot.lane.b32.xlu1 %v1710_v28, %s1354_s5 }
 0x111   : > { %624 = vrot.lane.b32.xlu0 %v1717_v31, %s1354_s5  ;;  %626 = vrot.lane.b32.xlu1 %v1720_v32, %s1354_s5 }
 0x115   : > { %652 = vrot.lane.b32.xlu0 %v1656_v60, %s1355_s12  ;;  %654 = vrot.lane.b32.xlu1 %v1666_v16, %s1355_s12 }
 0x119   : > { %656 = vrot.lane.b32.xlu0 %v1662_v62, %s1355_s12  ;;  %658 = vrot.lane.b32.xlu1 %v1674_v1, %s1355_s12 }
 0x11d   : > { %660 = vrot.lane.b32.xlu0 %v1681_v10, %s1355_s12  ;;  %662 = vrot.lane.b32.xlu1 %v1684_v18, %s1355_s12 }
 0x121   : > { %664 = vrot.lane.b32.xlu0 %v1692_v23, %s1355_s12  ;;  %666 = vrot.lane.b32.xlu1 %v1698_v25, %s1355_s12 }
 0x125   : > { %668 = vrot.lane.b32.xlu0 %v1702_v26, %s1355_s12  ;;  %670 = vrot.lane.b32.xlu1 %v1710_v28, %s1355_s12 }
 0x129   : > { %672 = vrot.lane.b32.xlu0 %v1717_v31, %s1355_s12  ;;  %674 = vrot.lane.b32.xlu1 %v1720_v32, %s1355_s12 }
 0x132   : > { %v509_v33 = vpop.permute.xlu0 %508 }
 0x133   : > { %v544_v17 = vmax.f32 %v1656_v60, %v509_v33 }
 0x136   : > { %v511_v34 = vpop.permute.xlu1 %510  ;;  %v513_v35 = vpop.permute.xlu0 %512 }
 0x137   : > { %v545_v0 = vmax.f32 %v1666_v16, %v511_v34  ;;  %v546_v19 = vmax.f32 %v1662_v62, %v513_v35 }
 0x13a   : > { %v515_v36 = vpop.permute.xlu1 %514 }
 0x13b   : > { %v547_v20 = vmax.f32 %v1674_v1, %v515_v36 }
 0x13f   : > { %v517_v37 = vpop.permute.xlu0 %516  ;;  %v519_v38 = vpop.permute.xlu1 %518 }
 0x140   : > { %v548_v16 = vmax.f32 %v1681_v10, %v517_v37  ;;  %v549_v30 = vmax.f32 %v1684_v18, %v519_v38 }
 0x143   : > { %v1786_v39 = vpop.permute.xlu0 %520 }
 0x144   : > { %v550_v10 = vmax.f32 %v1692_v23, %v1786_v39 }
 0x149   : > { %v1788_v40 = vpop.permute.xlu1 %522 }
 0x14a   : > { %v1790_v41 = vpop.permute.xlu0 %524  ;;  %v551_v18 = vmax.f32 %v1698_v25, %v1788_v40 }
 0x14b   : > { %v552_v23 = vmax.f32 %v1702_v26, %v1790_v41 }
 0x14e   : > { %v1792_v42 = vpop.permute.xlu1 %526 }
 0x14f   : > { %v553_v25 = vmax.f32 %v1710_v28, %v1792_v42 }
 0x153   : > { %v1794_v43 = vpop.permute.xlu0 %528  ;;  %v1796_v44 = vpop.permute.xlu1 %530 }
 0x154   : > { %v554_v26 = vmax.f32 %v1717_v31, %v1794_v43  ;;  %v555_v28 = vmax.f32 %v1720_v32, %v1796_v44 }
 0x157   : > { %v557_v45 = vpop.permute.xlu0 %556  ;;  %v559_v46 = vpop.permute.xlu1 %558 }
 0x158   : > { %v592_v7 = vmax.f32 %v544_v17, %v557_v45  ;;  %v593_v8 = vmax.f32 %v545_v0, %v559_v46 }
 0x15b   : > { %v561_v47 = vpop.permute.xlu0 %560  ;;  %v563_v48 = vpop.permute.xlu1 %562 }
 0x15c   : > { %v594_v14 = vmax.f32 %v546_v19, %v561_v47  ;;  %v595_v27 = vmax.f32 %v547_v20, %v563_v48 }
 0x15f   : > { %v565_v49 = vpop.permute.xlu0 %564  ;;  %v567_v50 = vpop.permute.xlu1 %566 }
 0x160   : > { %v596_v33 = vmax.f32 %v548_v16, %v565_v49  ;;  %v597_v34 = vmax.f32 %v549_v30, %v567_v50 }
 0x163   : > { %v569_v51 = vpop.permute.xlu0 %568  ;;  %v571_v52 = vpop.permute.xlu1 %570 }
 0x164   : > { %v598_v47 = vmax.f32 %v550_v10, %v569_v51  ;;  %v599_v48 = vmax.f32 %v551_v18, %v571_v52 }
 0x167   : > { %v573_v53 = vpop.permute.xlu0 %572  ;;  %v575_v54 = vpop.permute.xlu1 %574 }
 0x16b   : > { %v1798_v55 = vpop.permute.xlu0 %576  ;;  %v1800_v3 = vpop.permute.xlu1 %578 }
 0x16f   : > { %v605_v56 = vpop.permute.xlu0 %604  ;;  %v607_v57 = vpop.permute.xlu1 %606 }
 0x170   : > { %v640_v22 = vmax.f32 %v592_v7, %v605_v56  ;;  %v641_v24 = vmax.f32 %v593_v8, %v607_v57  ;;  %v600_v56 = vmax.f32 %v552_v23, %v573_v53  ;;  %v601_v57 = vmax.f32 %v553_v25, %v575_v54 }
 0x173   : > { %v609_v58 = vpop.permute.xlu0 %608  ;;  %v611_v59 = vpop.permute.xlu1 %610 }
 0x174   : > { %v642_v11 = vmax.f32 %v594_v14, %v609_v58  ;;  %v643_v15 = vmax.f32 %v595_v27, %v611_v59 }
 0x177   : > { %v613_v4 = vpop.permute.xlu0 %612  ;;  %v615_v5 = vpop.permute.xlu1 %614 }
 0x178   : > { %v644_v37 = vmax.f32 %v596_v33, %v613_v4  ;;  %v645_v38 = vmax.f32 %v597_v34, %v615_v5  ;;  %v602_v4 = vmax.f32 %v554_v26, %v1798_v55  ;;  %v603_v5 = vmax.f32 %v555_v28, %v1800_v3 }
 0x17b   : > { %v617_v61 = vpop.permute.xlu0 %616  ;;  %v619_v13 = vpop.permute.xlu1 %618 }
 0x17c   : > { %v646_v39 = vmax.f32 %v598_v47, %v617_v61  ;;  %v647_v40 = vmax.f32 %v599_v48, %v619_v13 }
 0x17f   : > { %v1802_v63 = vpop.permute.xlu0 %620  ;;  %v1804_v12 = vpop.permute.xlu1 %622 }
 0x180   : > { %v648_v41 = vmax.f32 %v600_v56, %v1802_v63  ;;  %v649_v42 = vmax.f32 %v601_v57, %v1804_v12 }
 0x183   : > { %v1808_v2 = vpop.permute.xlu0 %624  ;;  %v1810_v6 = vpop.permute.xlu1 %626 }
 0x184   : > { %v650_v32 = vmax.f32 %v602_v4, %v1808_v2  ;;  %v651_v44 = vmax.f32 %v603_v5, %v1810_v6 }
 0x187   : > { %v653_v21 = vpop.permute.xlu0 %652  ;;  %v655_v9 = vpop.permute.xlu1 %654 }
 0x188   : > { %v1814_v29 = vmax.f32 %v640_v22, %v653_v21  ;;  %v1816_v60 = vmax.f32 %v641_v24, %v655_v9 }
 0x18a   : > { %712 = vrot.lane.b32.xlu0 %v1814_v29, %s1355_s12  ;;  %714 = vrot.lane.b32.xlu1 %v1816_v60, %s1355_s12 }
 0x18b   : > { %v657_v62 = vpop.permute.xlu0 %656  ;;  %v659_v1 = vpop.permute.xlu1 %658 }
 0x18c   : > { %v1824_v35 = vmax.f32 %v642_v11, %v657_v62  ;;  %v1826_v36 = vmax.f32 %v643_v15, %v659_v1 }
 0x18e   : > { %716 = vrot.lane.b32.xlu0 %v1824_v35, %s1355_s12  ;;  %718 = vrot.lane.b32.xlu1 %v1826_v36, %s1355_s12 }
 0x18f   : > { %v661_v45 = vpop.permute.xlu0 %660  ;;  %v663_v46 = vpop.permute.xlu1 %662 }
 0x190   : > { %v1836_v49 = vmax.f32 %v644_v37, %v661_v45  ;;  %v1838_v50 = vmax.f32 %v645_v38, %v663_v46 }
 0x192   : > { %720 = vrot.lane.b32.xlu0 %v1836_v49, %s1355_s12  ;;  %722 = vrot.lane.b32.xlu1 %v1838_v50, %s1355_s12 }
 0x193   : > { %v665_v51 = vpop.permute.xlu0 %664  ;;  %v667_v52 = vpop.permute.xlu1 %666 }
 0x194   : > { %v1848_v58 = vmax.f32 %v646_v39, %v665_v51  ;;  %v1850_v59 = vmax.f32 %v647_v40, %v667_v52 }
 0x196   : > { %724 = vrot.lane.b32.xlu0 %v1848_v58, %s1355_s12  ;;  %726 = vrot.lane.b32.xlu1 %v1850_v59, %s1355_s12 }
 0x197   : > { %v669_v53 = vpop.permute.xlu0 %668  ;;  %v671_v54 = vpop.permute.xlu1 %670 }
 0x198   : > { %v1864_v31 = vmax.f32 %v648_v41, %v669_v53  ;;  %v1866_v43 = vmax.f32 %v649_v42, %v671_v54 }
 0x19a   : > { %728 = vrot.lane.b32.xlu0 %v1864_v31, %s1355_s12  ;;  %730 = vrot.lane.b32.xlu1 %v1866_v43, %s1355_s12 }
 0x19b   : > { %v673_v61 = vpop.permute.xlu0 %672  ;;  %v675_v13 = vpop.permute.xlu1 %674 }
 0x19c   : > { %v1874_v63 = vmax.f32 %v650_v32, %v673_v61  ;;  %v1876_v55 = vmax.f32 %v651_v44, %v675_v13 }
 0x19e   : > { %732 = vrot.lane.b32.xlu0 %v1874_v63, %s1355_s12  ;;  %734 = vrot.lane.b32.xlu1 %v1876_v55, %s1355_s12 }
 0x1a2   : > { %894 = vrot.lane.b32.xlu0 %v1814_v29, %s1356_s13  ;;  %896 = vrot.lane.b32.xlu1 %v1816_v60, %s1356_s13 }
 0x1a6   : > { %898 = vrot.lane.b32.xlu0 %v1824_v35, %s1356_s13  ;;  %900 = vrot.lane.b32.xlu1 %v1826_v36, %s1356_s13 }
 0x1aa   : > { %902 = vrot.lane.b32.xlu0 %v1836_v49, %s1356_s13  ;;  %904 = vrot.lane.b32.xlu1 %v1838_v50, %s1356_s13 }
 0x1ae   : > { %906 = vrot.lane.b32.xlu0 %v1848_v58, %s1356_s13  ;;  %908 = vrot.lane.b32.xlu1 %v1850_v59, %s1356_s13 }
 0x1b2   : > { %910 = vrot.lane.b32.xlu0 %v1864_v31, %s1356_s13  ;;  %912 = vrot.lane.b32.xlu1 %v1866_v43, %s1356_s13 }
 0x1b6   : > { %914 = vrot.lane.b32.xlu0 %v1874_v63, %s1356_s13  ;;  %916 = vrot.lane.b32.xlu1 %v1876_v55, %s1356_s13 }
 0x1fc   : > { %v713_v3 = vpop.permute.xlu0 %712  ;;  %v715_v12 = vpop.permute.xlu1 %714 }
 0x1fd   : > { %1121 = vst.msk [vmem:[%s1502_s18 + $0x3c] sm:$0xf0] %vm749_vm7, %v713_v3  ;;  %v764_v6 = vmax.f32 %v1816_v60, %v715_v12  ;;  %v763_v1 = vmax.f32 %v1814_v29, %v713_v3 }
 0x1fe   : > { %1122 = vst.msk [vmem:[%s1502_s18 + $0x44] sm:$0xff] %vm164_vm0, %v715_v12 }
 0x1ff   : > { %v788_v24 = vrot.slane %v764_v6, 4  ;;  %v787_v37 = vrot.slane %v763_v1, 4 }
 0x200   : > { %v717_v17 = vpop.permute.xlu0 %716  ;;  %v719_v0 = vpop.permute.xlu1 %718 }
 0x201   : > { %1123 = vst.msk [vmem:[%s1502_s18 + $0x4c] sm:$0xf] %vm752_vm8, %v717_v17  ;;  %v1901_v2 = vmax.f32 %v1824_v35, %v717_v17  ;;  %v766_v21 = vmax.f32 %v1826_v36, %v719_v0 }
 0x202   : > { %1124 = vst.msk [vmem:[%s1502_s18 + $0x4c] sm:$0xf0] %vm749_vm7, %v719_v0 }
 0x203   : > { %v790_v7 = vrot.slane %v1901_v2, 4  ;;  %v792_v30 = vrot.slane %v766_v21, 4 }
 0x204   : > { %v721_v8 = vpop.permute.xlu0 %720  ;;  %v723_v19 = vpop.permute.xlu1 %722 }
 0x205   : > { %1125 = vst.msk [vmem:[%s1502_s18 + $0x54] sm:$0xff] %vm164_vm0, %v721_v8  ;;  %v821_v20 = vmax.f32 %v1901_v2, %v790_v7  ;;  %v1913_v22 = vmax.f32 %v1838_v50, %v723_v19  ;;  %v1917_v9 = vmax.f32 %v1836_v49, %v721_v8  ;;  %v791_v62 = vsel %vm372_vm4, %v788_v24, %v790_v7 }
 0x206   : > { %1126 = vst.msk [vmem:[%s1502_s18 + $0x5c] sm:$0xf] %vm752_vm8, %v723_v19  ;;  %v820_v36 = vmax.f32 %v764_v6, %v791_v62  ;;  %v789_v50 = vsel %vm372_vm4, %v787_v37, %v788_v24 }
 0x207   : > { %847 = vrot.lane.b32.xlu0 %v821_v20, %s1353_s2  ;;  %v795_v14 = vrot.slane %v1913_v22, 4  ;;  %v793_v11 = vrot.slane %v1917_v9, 4  ;;  %v819_v56 = vmax.f32 %v763_v1, %v789_v50 }
 0x208   : > { %v725_v27 = vpop.permute.xlu0 %724  ;;  %v727_v60 = vpop.permute.xlu1 %726 }
 0x209   : > { %1127 = vst.msk [vmem:[%s1502_s18 + $0x5c] sm:$0xf0] %vm749_vm7, %v725_v27  ;;  %v824_v16 = vmax.f32 %v1913_v22, %v795_v14  ;;  %v1928_v15 = vmax.f32 %v1850_v59, %v727_v60  ;;  %v794_v29 = vsel %vm372_vm4, %v792_v30, %v793_v11  ;;  %v769_v23 = vmax.f32 %v1848_v58, %v725_v27 }
 0x20a   : > { %1128 = vst.msk [vmem:[%s1502_s18 + $0x64] sm:$0xff] %vm164_vm0, %v727_v60  ;;  %v822_v49 = vmax.f32 %v766_v21, %v794_v29  ;;  %v796_v58 = vsel %vm372_vm4, %v793_v11, %v795_v14 }
 0x20b   : > { %853 = vrot.lane.b32.xlu1 %v824_v16, %s1353_s2  ;;  %v798_v10 = vrot.slane %v1928_v15, 4  ;;  %v797_v41 = vrot.slane %v769_v23, 4 }
 0x20c   : > { %v729_v33 = vpop.permute.xlu0 %728  ;;  %v731_v34 = vpop.permute.xlu1 %730 }
 0x20d   : > { %1129 = vst.msk [vmem:[%s1502_s18 + $0x6c] sm:$0xf] %vm752_vm8, %v729_v33  ;;  %v1936_v35 = vmax.f32 %v1864_v31, %v729_v33  ;;  %v1942_v18 = vmax.f32 %v1866_v43, %v731_v34  ;;  %v823_v31 = vmax.f32 %v1917_v9, %v796_v58  ;;  %v799_v32 = vsel %vm372_vm4, %v797_v41, %v798_v10 }
 0x20e   : > { %1130 = vst.msk [vmem:[%s1502_s18 + $0x6c] sm:$0xf0] %vm749_vm7, %v731_v34  ;;  %v825_v0 = vmax.f32 %v769_v23, %v799_v32 }
 0x20f   : > { %845 = vrot.lane.b32.xlu1 %v820_v36, %s1353_s2  ;;  %v800_v38 = vrot.slane %v1936_v35, 4  ;;  %v802_v25 = vrot.slane %v1942_v18, 4 }
 0x210   : > { %v733_v45 = vpop.permute.xlu0 %732  ;;  %v735_v46 = vpop.permute.xlu1 %734 }
 0x211   : > { %1131 = vst.msk [vmem:[%s1502_s18 + $0x74] sm:$0xff] %vm164_vm0, %v733_v45  ;;  %v1950_v47 = vmax.f32 %v1874_v63, %v733_v45  ;;  %v827_v48 = vmax.f32 %v1936_v35, %v800_v38  ;;  %v801_v39 = vsel %vm372_vm4, %v798_v10, %v800_v38  ;;  %v1963_v51 = vmax.f32 %v1876_v55, %v735_v46 }
 0x212   : > { %1132 = vst.msk [vmem:[%s1502_s18 + $0x7c] sm:$0xf] %vm752_vm8, %v735_v46  ;;  %v826_v28 = vmax.f32 %v1928_v15, %v801_v39 }
 0x213   : > { %v803_v40 = vrot.slane %v1950_v47, 4  ;;  %859 = vrot.lane.b32.xlu0 %v827_v48, %s1353_s2  ;;  %849 = vrot.lane.b32.xlu1 %v822_v49, %s1353_s2  ;;  %v805_v4 = vrot.slane %v1963_v51, 4 }
 0x214   : > { %v895_v52 = vpop.permute.xlu0 %894  ;;  %v897_v57 = vpop.permute.xlu1 %896 }
 0x215   : > { %v930_v59 = vmax.f32 %v763_v1, %v895_v52  ;;  %v931_v26 = vmax.f32 %v764_v6, %v897_v57  ;;  %v804_v42 = vsel %vm372_vm4, %v802_v25, %v803_v40  ;;  %v806_v7 = vsel %vm372_vm4, %v803_v40, %v805_v4 }
 0x216   : > { %v828_v63 = vmax.f32 %v1942_v18, %v804_v42  ;;  %v830_v8 = vmax.f32 %v1963_v51, %v805_v4  ;;  %v829_v30 = vmax.f32 %v1950_v47, %v806_v7 }
 0x217   : > { %v954_v53 = vrot.slane %v930_v59, 4  ;;  %843 = vrot.lane.b32.xlu0 %v819_v56, %s1353_s2  ;;  %v955_v54 = vrot.slane %v931_v26, 4  ;;  %857 = vrot.lane.b32.xlu1 %v826_v28, %s1353_s2 }
 0x218   : > { %v899_v5 = vpop.permute.xlu0 %898  ;;  %v901_v43 = vpop.permute.xlu1 %900 }
 0x219   : > { %v956_v44 = vsel %vm372_vm4, %v954_v53, %v955_v54  ;;  %v932_v61 = vmax.f32 %v1901_v2, %v899_v5  ;;  %v933_v13 = vmax.f32 %v766_v21, %v901_v43 }
 0x21a   : > { %v982_v55 = vmax.f32 %v930_v59, %v956_v44 }
 0x21b   : > { %v957_v3 = vrot.slane %v932_v61, 4  ;;  %851 = vrot.lane.b32.xlu0 %v823_v31, %s1353_s2  ;;  %861 = vrot.lane.b32.xlu1 %v828_v63, %s1353_s2  ;;  %v959_v19 = vrot.slane %v933_v13, 4 }
 0x21c   : > { %v990_v12 = vmax.f32 %v982_v55, %v931_v26  ;;  %v903_v17 = vpop.permute.xlu0 %902  ;;  %v905_v6 = vpop.permute.xlu1 %904 }
 0x21d   : > { %v958_v2 = vsel %vm372_vm4, %v955_v54, %v957_v3  ;;  %v934_v20 = vmax.f32 %v1917_v9, %v903_v17  ;;  %v935_v24 = vmax.f32 %v1913_v22, %v905_v6 }
 0x21e   : > { %1145 = vst.msk [vmem:[%s1502_s18 + $0xc0] sm:$0xff] %vm164_vm0, %v990_v12  ;;  %v983_v21 = vmax.f32 %v931_v26, %v958_v2 }
 0x21f   : > { %v960_v14 = vrot.slane %v934_v20, 4  ;;  %855 = vrot.lane.b32.xlu0 %v825_v0, %s1353_s2  ;;  %v962_v27 = vrot.slane %v935_v24, 4  ;;  %865 = vrot.lane.b32.xlu1 %v830_v8, %s1353_s2 }
 0x220   : > { %v991_v60 = vmax.f32 %v983_v21, %v932_v61  ;;  %v907_v16 = vpop.permute.xlu0 %906  ;;  %v909_v11 = vpop.permute.xlu1 %908 }
 0x221   : > { %v961_v62 = vsel %vm372_vm4, %v959_v19, %v960_v14  ;;  %v963_v9 = vsel %vm372_vm4, %v960_v14, %v962_v27  ;;  %v936_v22 = vmax.f32 %v769_v23, %v907_v16  ;;  %v937_v1 = vmax.f32 %v1928_v15, %v909_v11 }
 0x222   : > { %1146 = vst.msk [vmem:[%s1502_s18 + $0xc8] sm:$0xff] %vm164_vm0, %v991_v60  ;;  %v984_v33 = vmax.f32 %v933_v13, %v961_v62  ;;  %v985_v34 = vmax.f32 %v934_v20, %v963_v9 }
 0x223   : > { %v964_v36 = vrot.slane %v936_v22, 4  ;;  %863 = vrot.lane.b32.xlu0 %v829_v30, %s1353_s2  ;;  %v965_v10 = vrot.slane %v937_v1, 4 }
 0x224   : > { %v992_v29 = vmax.f32 %v984_v33, %v934_v20  ;;  %v993_v37 = vmax.f32 %v985_v34, %v935_v24  ;;  %v911_v38 = vpop.permute.xlu0 %910  ;;  %v913_v45 = vpop.permute.xlu1 %912 }
 0x225   : > { %v966_v46 = vsel %vm372_vm4, %v964_v36, %v965_v10  ;;  %v938_v48 = vmax.f32 %v1936_v35, %v911_v38  ;;  %v939_v49 = vmax.f32 %v1942_v18, %v913_v45 }
 0x226   : > { %1147 = vst.msk [vmem:[%s1502_s18 + $0xd0] sm:$0xff] %vm164_vm0, %v992_v29  ;;  %1148 = vst.msk [vmem:[%s1502_s18 + $0xd8] sm:$0xff] %vm164_vm0, %v993_v37  ;;  %v986_v15 = vmax.f32 %v936_v22, %v966_v46 }
 0x227   : > { %v967_v50 = vrot.slane %v938_v48, 4  ;;  %v969_v52 = vrot.slane %v939_v49, 4 }
 0x228   : > { %v994_v23 = vmax.f32 %v986_v15, %v937_v1  ;;  %v915_v25 = vpop.permute.xlu0 %914  ;;  %v917_v39 = vpop.permute.xlu1 %916 }
 0x229   : > { %v968_v40 = vsel %vm372_vm4, %v965_v10, %v967_v50  ;;  %v940_v56 = vmax.f32 %v1950_v47, %v915_v25  ;;  %v941_v35 = vmax.f32 %v1963_v51, %v917_v39 }
 0x22a   : > { %1149 = vst.msk [vmem:[%s1502_s18 + $0xe0] sm:$0xff] %vm164_vm0, %v994_v23  ;;  %v987_v18 = vmax.f32 %v937_v1, %v968_v40 }
 0x22b   : > { %v970_v57 = vrot.slane %v940_v56, 4  ;;  %v972_v59 = vrot.slane %v941_v35, 4 }
 0x22c   : > { %v995_v26 = vmax.f32 %v987_v18, %v938_v48 }
 0x22d   : > { %v971_v58 = vsel %vm372_vm4, %v969_v52, %v970_v57  ;;  %v973_v28 = vsel %vm372_vm4, %v970_v57, %v972_v59 }
 0x22e   : > { %1150 = vst.msk [vmem:[%s1502_s18 + $0xe8] sm:$0xff] %vm164_vm0, %v995_v26  ;;  %v988_v41 = vmax.f32 %v939_v49, %v971_v58  ;;  %v989_v47 = vmax.f32 %v940_v56, %v973_v28 }
 0x230   : > { %v996_v51 = vmax.f32 %v988_v41, %v940_v56  ;;  %v997_v42 = vmax.f32 %v989_v47, %v941_v35 }
 0x232   : > { %1151 = vst.msk [vmem:[%s1502_s18 + $0xf0] sm:$0xff] %vm164_vm0, %v996_v51  ;;  %1152 = vst.msk [vmem:[%s1502_s18 + $0xf8] sm:$0xff] %vm164_vm0, %v997_v42 }
 0x279   : > { %v848_v53 = vpop.permute.xlu0 %847 }
 0x27a   : > { %1135 = vst.msk [vmem:[%s1502_s18 + $0x8e] sm:$0x3] %vm883_vm9, %v848_v53 }
 0x27d   : > { %v854_v54 = vpop.permute.xlu1 %853 }
 0x27e   : > { %1138 = vst.msk [vmem:[%s1502_s18 + $0x9e] sm:$0x3] %vm883_vm9, %v854_v54 }
 0x281   : > { %v846_v4 = vpop.permute.xlu1 %845 }
 0x282   : > { %1134 = vst.msk [vmem:[%s1502_s18 + $0x86] sm:$0xff] %vm164_vm0, %v846_v4 }
 0x285   : > { %v860_v5 = vpop.permute.xlu0 %859  ;;  %v850_v31 = vpop.permute.xlu1 %849 }
 0x286   : > { %1141 = vst.msk [vmem:[%s1502_s18 + $0xae] sm:$0x3] %vm883_vm9, %v860_v5 }
 0x287   : > { %1136 = vst.msk [vmem:[%s1502_s18 + $0x8e] sm:$0xfc] %vm880_vm10, %v850_v31 }
 0x289   : > { %v844_v43 = vpop.permute.xlu0 %843  ;;  %v858_v32 = vpop.permute.xlu1 %857 }
 0x28a   : > { %1133 = vst.msk [vmem:[%s1502_s18 + $0x7e] sm:$0xfc] %vm880_vm10, %v844_v43 }
 0x28b   : > { %1140 = vst.msk [vmem:[%s1502_s18 + $0xa6] sm:$0xff] %vm164_vm0, %v858_v32 }
 0x28d   : > { %v852_v44 = vpop.permute.xlu0 %851  ;;  %v862_v61 = vpop.permute.xlu1 %861 }
 0x28e   : > { %1137 = vst.msk [vmem:[%s1502_s18 + $0x96] sm:$0xff] %vm164_vm0, %v852_v44 }
 0x28f   : > { %1142 = vst.msk [vmem:[%s1502_s18 + $0xae] sm:$0xfc] %vm880_vm10, %v862_v61 }
 0x291   : > { %v856_v13 = vpop.permute.xlu0 %855  ;;  %v866_v63 = vpop.permute.xlu1 %865 }
 0x292   : > { %1139 = vst.msk [vmem:[%s1502_s18 + $0x9e] sm:$0xfc] %vm880_vm10, %v856_v13 }
 0x293   : > { %1144 = vst.msk [vmem:[%s1502_s18 + $0xbe] sm:$0x3] %vm883_vm9, %v866_v63 }
 0x295   : > { %v864_v55 = vpop.permute.xlu0 %863 }
 0x296   : > { %1143 = vst.msk [vmem:[%s1502_s18 + $0xb6] sm:$0xff] %vm164_vm0, %v864_v55 }
 0x297   : > { %1276 = shalt.err (!%p1273_p5)
}
 0x298   : > { %s1277_s4 = scalar_lea.hbm %s2041_s23, 4096  ;;  %s1281_s29 = scalar_lea.hbm %s2095_s1, 8192 }
 0x299   : > { %p1278_p4 = scmp.ne.s32.totalorder %s2041_s23, %s1277_s4  ;;  %p1282_p12 = scmp.lt.u32.totalorder %s2041_s23, %s2095_s1 }
 0x29a   : > { %p1283_p1 = scmp.lt.u32.totalorder %s1281_s29, %s1277_s4  ;;  %p1285_p8 = scmp.lt.u32.totalorder %s1277_s4, %s2041_s23 }
 0x29b   : > { %p1279_p7 = pnand %p1278_p4, %p2103_p9 }
 0x29c   : > { %p1284_p3 = por %p1283_p1, %p1282_p12 }
 0x29d   : > { %p1280_p10 = pneg %p1279_p7 }
 0x29e   : > { %p1286_p11 = por %p1285_p8, %p1284_p3 }
 0x2a0   : > { %p1287_p0 = pnand %p1286_p11, %p1280_p10 }
 0x2a2   : > { %1290 = shalt.err (!%p1287_p0)
}
 0x2a3   : > { %s1358_s5 = smov 128   ;;  %s1359_s12 = smov 8  }
 0x2a4   : > { %1162 = dma.vmem_to_hbm [thread:$0]  (%p2103_p9), %s2043_s16, 4096, %s2041_s23, %s1008_s9, %s1358_s5, %s1358_s5, %s1359_s12  }
 0x2a5 PF: > { %s1039_s13 = sand.u32 1, %s1325_s6   ;;  %p2104_p6 = scmp.ne.s32.totalorder %s2100_s21, 0 }
 0x2a6   : > { %p2105_p13 = scmp.ge.s32.totalorder %s1345_s11, 2  ;;  %s1040_s15 = scalar_lea.sflag [#allocation4], %s1039_s13 }
 0x2a8   : > { %p1169_p2 = pnand %p2105_p13, %p2104_p6 }
 0x2aa   : > { %1320 = dma.done.wait (!%p1169_p2), %s1040_s15, 4096  }
 0x2ab   : > { %1322 = vsyncadd (!%p1169_p2), %s1040_s15, 4294963200  ;;  %s17_s11 = sadd.s32 1, %s1345_s11   ;;  %s2106_s6 = smov %s1329_s7 }
 0x2ac   : > { %p14_p5 = scmp.ge.s32.totalorder %s17_s11, 4   ;;  %s2107_s7 = smov %s1333_s8 }
 0x2ad   : > { %s2108_s8 = smov %s1426_s20  ;;  %s2109_s9 = smov %s1341_s10 }
 0x2ae   : > { %s2110_s10 = smov %s2112_s14  ;;  %16 = sbr.rel (!%p14_p5) target bundleno = 6 (0x6), region = 72 }
 0x2b5   :  { %1045 = vsyncpa [#allocation3], 1 }
 0x2b6   :  { %1047 = vsyncpa [#allocation3 + $0x1], 1 }
 0x2b7   :  { %1048 = vsyncpa [#allocation4], 1 }
 0x2b8   :  { %1050 = vsyncpa [#allocation4 + $0x1], 1 }

</bundles_post_ra>
